<compile_context>
chip_gen: v6e
topology: v6e:2x2x1
jax: 0.10.0
libtpu: 0.0.40
codegen_flags: <defaults>
</compile_context>

<pallas_src>
import math

import jax
import jax.numpy as jnp
import numpy as np
from jax.experimental import pallas as pl
from jax.experimental.pallas import tpu as pltpu


# --------------------------------------------------------------------------
# Fused kernel: one grid step per batch element.
# --------------------------------------------------------------------------
def _bahdanau_kernel(ctx_ref, h_ref, x_ref,
                     wenc_ref, benc_ref, wdec_ref, bdec_ref,
                     vw_ref, vb_ref,
                     wre_c_ref, wre_h_ref, wre_x_ref, bre_ref,
                     wro_c_ref, wro_h_ref, wro_x_ref, bro_ref,
                     out_ref, wts_ref):
    ctx = ctx_ref[0]          # (S, H)   encoder context for this batch element
    hb = h_ref[0]             # (1, H)   decoder hidden state
    xb = x_ref[0]             # (1, E)   input embedding

    # --- additive-attention energies -------------------------------------
    ge = jnp.dot(ctx, wenc_ref[...], preferred_element_type=jnp.float32) + benc_ref[...]  # (S, H)
    gd = jnp.dot(hb, wdec_ref[...], preferred_element_type=jnp.float32) + bdec_ref[...]   # (1, H)
    t = jnp.tanh(ge + gd)                                                                 # (S, H)

    # logits as a lane-dense (1, S) row: contract v_w (1, H) with t (S, H) over H.
    logits = jax.lax.dot_general(
        vw_ref[...], t, (((1,), (1,)), ((), ())),
        preferred_element_type=jnp.float32) + vb_ref[...]                                 # (1, S)

    # --- softmax over the source positions (lane axis) --------------------
    m = jnp.max(logits, axis=-1, keepdims=True)
    e = jnp.exp(logits - m)
    w_row = e / jnp.sum(e, axis=-1, keepdims=True)                                        # (1, S)

    # --- context vector ----------------------------------------------------
    c_t = jnp.dot(w_row, ctx, preferred_element_type=jnp.float32)                         # (1, H)

    # --- Linear_r on cat([c_t, h, x]) done as split matmuls, then maxout ---
    r_even = (jnp.dot(c_t, wre_c_ref[...], preferred_element_type=jnp.float32)
              + jnp.dot(hb, wre_h_ref[...], preferred_element_type=jnp.float32)
              + jnp.dot(xb, wre_x_ref[...], preferred_element_type=jnp.float32)
              + bre_ref[...])                                                             # (1, H)
    r_odd = (jnp.dot(c_t, wro_c_ref[...], preferred_element_type=jnp.float32)
             + jnp.dot(hb, wro_h_ref[...], preferred_element_type=jnp.float32)
             + jnp.dot(xb, wro_x_ref[...], preferred_element_type=jnp.float32)
             + bro_ref[...])                                                              # (1, H)

    out_ref[0] = jnp.maximum(r_even, r_odd)   # (1, H)
    wts_ref[0] = w_row                        # (1, S)


# --------------------------------------------------------------------------
# Wrapper: host-side weight layout prep + pallas_call.
# --------------------------------------------------------------------------
def bahdanau_attention(h, x, context, params):
    """Forward pass matching the PyTorch module.

    Args:
      h:       (B, H)     decoder hidden state.
      x:       (B, E)     input embedding.
      context: (B, S, H)  i.e. `self.context` AFTER init_context's transpose(0, 1).
      params:  dict with PyTorch-convention weights (W[out, in], biases 1-D).

    Returns: (output (B, H), weights (B, S))
    """
    B, S, H = context.shape
    E = x.shape[1]

    # ---- one-time host-side weight layout plumbing (no .T inside kernel) ----
    wenc_t = params["w_enc"].T                     # (H, H)
    wdec_t = params["w_dec"].T                     # (H, H)
    benc = params["b_enc"].reshape(1, H)
    bdec = params["b_dec"].reshape(1, H)
    vw = params["w_v"].reshape(1, H)               # linear_v weight (1, H)
    vb = params["b_v"].reshape(1, 1)

    wr = params["w_r"]                             # (2H, 2H+E)
    br = params["b_r"]                             # (2H,)
    wr_e, wr_o = wr[0::2], wr[1::2]                # maxout pairs -> even / odd rows
    wre_c, wre_h, wre_x = wr_e[:, :H].T, wr_e[:, H:2 * H].T, wr_e[:, 2 * H:].T
    wro_c, wro_h, wro_x = wr_o[:, :H].T, wr_o[:, H:2 * H].T, wr_o[:, 2 * H:].T
    bre = br[0::2].reshape(1, H)
    bro = br[1::2].reshape(1, H)

    h3 = h.reshape(B, 1, H)
    x3 = x.reshape(B, 1, E)

    const = lambda b: (0, 0)     # weights: same block every step -> DMA'd once

    out3, wts3 = pl.pallas_call(
        _bahdanau_kernel,
        grid=(B,),
        in_specs=[
            pl.BlockSpec((1, S, H), lambda b: (b, 0, 0)),   # context
            pl.BlockSpec((1, 1, H), lambda b: (b, 0, 0)),   # h
            pl.BlockSpec((1, 1, E), lambda b: (b, 0, 0)),   # x
            pl.BlockSpec((H, H), const),                    # W_enc^T
            pl.BlockSpec((1, H), const),                    # b_enc
            pl.BlockSpec((H, H), const),                    # W_dec^T
            pl.BlockSpec((1, H), const),                    # b_dec
            pl.BlockSpec((1, H), const),                    # v_w
            pl.BlockSpec((1, 1), const),                    # v_b
            pl.BlockSpec((H, H), const),                    # Wr_even[:, c]^T
            pl.BlockSpec((H, H), const),                    # Wr_even[:, h]^T
            pl.BlockSpec((E, H), const),                    # Wr_even[:, x]^T
            pl.BlockSpec((1, H), const),                    # b_r even
            pl.BlockSpec((H, H), const),                    # Wr_odd[:, c]^T
            pl.BlockSpec((H, H), const),                    # Wr_odd[:, h]^T
            pl.BlockSpec((E, H), const),                    # Wr_odd[:, x]^T
            pl.BlockSpec((1, H), const),                    # b_r odd
        ],
        out_specs=[
            pl.BlockSpec((1, 1, H), lambda b: (b, 0, 0)),
            pl.BlockSpec((1, 1, S), lambda b: (b, 0, 0)),
        ],
        out_shape=[
            jax.ShapeDtypeStruct((B, 1, H), jnp.float32),
            jax.ShapeDtypeStruct((B, 1, S), jnp.float32),
        ],
        compiler_params=pltpu.CompilerParams(
            dimension_semantics=("parallel",)),
    )(context, h3, x3,
      wenc_t, benc, wdec_t, bdec, vw, vb,
      wre_c, wre_h, wre_x, bre, wro_c, wro_h, wro_x, bro)

    return out3.reshape(B, H), wts3.reshape(B, S)


# --------------------------------------------------------------------------
# Pure-JAX reference (correctness check).
# --------------------------------------------------------------------------
def _reference(h, x, context, params):
    H = h.shape[1]
    ge = context @ params["w_enc"].T + params["b_enc"]                 # (B, S, H)
    gd = (h @ params["w_dec"].T + params["b_dec"])[:, None, :]         # (B, 1, H)
    wts = (jnp.tanh(ge + gd) @ params["w_v"].T + params["b_v"])[..., 0]  # (B, S)
    wts = jax.nn.softmax(wts, axis=1)
    c_t = jnp.einsum("bs,bsh->bh", wts, context)                       # (B, H)
    cat = jnp.concatenate([c_t, h, x], axis=1)                         # (B, 2H+E)
    r = cat @ params["w_r"].T + params["b_r"]                          # (B, 2H)
    out = jnp.max(r.reshape(r.shape[0], H, 2), axis=2)                 # (B, H)
    return out, wts


# --------------------------------------------------------------------------
if __name__ == "__main__":
    # Small shapes consistent with the module's forward.
    H, E = 32, 16          # hidden_size, emb_size
    B, S = 2, 8            # batch, source sequence length

    key = jax.random.PRNGKey(0)
    ks = jax.random.split(key, 12)

    def lin_init(kw, kb, out_f, in_f):
        lim = 1.0 / math.sqrt(in_f)       # nn.Linear default init
        w = jax.random.uniform(kw, (out_f, in_f), jnp.float32, -lim, lim)
        b = jax.random.uniform(kb, (out_f,), jnp.float32, -lim, lim)
        return w, b

    w_enc, b_enc = lin_init(ks[0], ks[1], H, H)
    w_dec, b_dec = lin_init(ks[2], ks[3], H, H)
    w_v, b_v = lin_init(ks[4], ks[5], 1, H)
    w_r, b_r = lin_init(ks[6], ks[7], 2 * H, 2 * H + E)

    params = {
        "w_enc": w_enc, "b_enc": b_enc,
        "w_dec": w_dec, "b_dec": b_dec,
        "w_v": w_v, "b_v": b_v,
        "w_r": w_r, "b_r": b_r,
    }

    # context is stored batch-major, mirroring init_context's transpose(0, 1).
    context = jax.random.normal(ks[8], (B, S, H), jnp.float32)
    h = jax.random.normal(ks[9], (B, H), jnp.float32)
    x = jax.random.normal(ks[10], (B, E), jnp.float32)

    out, wts = bahdanau_attention(h, x, context, params)
    out, wts = jax.block_until_ready((out, wts))

    ref_out, ref_wts = _reference(h, x, context, params)
    np.testing.assert_allclose(np.asarray(out), np.asarray(ref_out), atol=2e-4, rtol=2e-4)
    np.testing.assert_allclose(np.asarray(wts), np.asarray(ref_wts), atol=2e-4, rtol=2e-4)

    print("KERNEL_OK")
</pallas_src>

<mosaic_0001>
module attributes {stable_mosaic.version = 11 : i64} {
  func.func @_bahdanau_kernel(%arg0: i32, %arg1: memref<1x8x32xf32, #tpu.memory_space<vmem>>, %arg2: memref<1x1x32xf32, #tpu.memory_space<vmem>>, %arg3: memref<1x1x16xf32, #tpu.memory_space<vmem>>, %arg4: memref<32x32xf32, #tpu.memory_space<vmem>>, %arg5: memref<1x32xf32, #tpu.memory_space<vmem>>, %arg6: memref<32x32xf32, #tpu.memory_space<vmem>>, %arg7: memref<1x32xf32, #tpu.memory_space<vmem>>, %arg8: memref<1x32xf32, #tpu.memory_space<vmem>>, %arg9: memref<1x1xf32, #tpu.memory_space<vmem>>, %arg10: memref<32x32xf32, #tpu.memory_space<vmem>>, %arg11: memref<32x32xf32, #tpu.memory_space<vmem>>, %arg12: memref<16x32xf32, #tpu.memory_space<vmem>>, %arg13: memref<1x32xf32, #tpu.memory_space<vmem>>, %arg14: memref<32x32xf32, #tpu.memory_space<vmem>>, %arg15: memref<32x32xf32, #tpu.memory_space<vmem>>, %arg16: memref<16x32xf32, #tpu.memory_space<vmem>>, %arg17: memref<1x32xf32, #tpu.memory_space<vmem>>, %arg18: memref<1x1x32xf32, #tpu.memory_space<vmem>>, %arg19: memref<1x1x8xf32, #tpu.memory_space<vmem>>) attributes {dimension_semantics = [#tpu.dimension_semantics<parallel>], iteration_bounds = array<i64: 2>, scalar_prefetch = 0 : i64, scratch_operands = 0 : i64, tpu.core_type = #tpu.core_type<tc>, window_params = [{transform_indices = @transform_0, window_bounds = array<i64: 1, 8, 32>}, {transform_indices = @transform_1, window_bounds = array<i64: 1, 1, 32>}, {transform_indices = @transform_2, window_bounds = array<i64: 1, 1, 16>}, {pipeline_mode = #tpu.pipeline_mode<synchronous>, transform_indices = @transform_3, window_bounds = array<i64: 32, 32>}, {pipeline_mode = #tpu.pipeline_mode<synchronous>, transform_indices = @transform_4, window_bounds = array<i64: 1, 32>}, {pipeline_mode = #tpu.pipeline_mode<synchronous>, transform_indices = @transform_5, window_bounds = array<i64: 32, 32>}, {pipeline_mode = #tpu.pipeline_mode<synchronous>, transform_indices = @transform_6, window_bounds = array<i64: 1, 32>}, {pipeline_mode = #tpu.pipeline_mode<synchronous>, transform_indices = @transform_7, window_bounds = array<i64: 1, 32>}, {pipeline_mode = #tpu.pipeline_mode<synchronous>, transform_indices = @transform_8, window_bounds = array<i64: 1, 1>}, {pipeline_mode = #tpu.pipeline_mode<synchronous>, transform_indices = @transform_9, window_bounds = array<i64: 32, 32>}, {pipeline_mode = #tpu.pipeline_mode<synchronous>, transform_indices = @transform_10, window_bounds = array<i64: 32, 32>}, {pipeline_mode = #tpu.pipeline_mode<synchronous>, transform_indices = @transform_11, window_bounds = array<i64: 16, 32>}, {pipeline_mode = #tpu.pipeline_mode<synchronous>, transform_indices = @transform_12, window_bounds = array<i64: 1, 32>}, {pipeline_mode = #tpu.pipeline_mode<synchronous>, transform_indices = @transform_13, window_bounds = array<i64: 32, 32>}, {pipeline_mode = #tpu.pipeline_mode<synchronous>, transform_indices = @transform_14, window_bounds = array<i64: 32, 32>}, {pipeline_mode = #tpu.pipeline_mode<synchronous>, transform_indices = @transform_15, window_bounds = array<i64: 16, 32>}, {pipeline_mode = #tpu.pipeline_mode<synchronous>, transform_indices = @transform_16, window_bounds = array<i64: 1, 32>}, {transform_indices = @transform_17, window_bounds = array<i64: 1, 1, 32>}, {transform_indices = @transform_18, window_bounds = array<i64: 1, 1, 8>}]} {
    %c0 = arith.constant 0 : index
    %c0_0 = arith.constant 0 : index
    %c0_1 = arith.constant 0 : index
    %0 = vector.load %arg1[%c0, %c0_0, %c0_1] : memref<1x8x32xf32, #tpu.memory_space<vmem>>, vector<1x8x32xf32>
    %1 = vector.shape_cast %0 : vector<1x8x32xf32> to vector<8x32xf32>
    %c0_2 = arith.constant 0 : index
    %c0_3 = arith.constant 0 : index
    %c0_4 = arith.constant 0 : index
    %2 = vector.load %arg2[%c0_2, %c0_3, %c0_4] : memref<1x1x32xf32, #tpu.memory_space<vmem>>, vector<1x1x32xf32>
    %3 = vector.shape_cast %2 : vector<1x1x32xf32> to vector<1x32xf32>
    %c0_5 = arith.constant 0 : index
    %c0_6 = arith.constant 0 : index
    %c0_7 = arith.constant 0 : index
    %4 = vector.load %arg3[%c0_5, %c0_6, %c0_7] : memref<1x1x16xf32, #tpu.memory_space<vmem>>, vector<1x1x16xf32>
    %5 = vector.shape_cast %4 : vector<1x1x16xf32> to vector<1x16xf32>
    %c0_8 = arith.constant 0 : index
    %c0_9 = arith.constant 0 : index
    %6 = vector.load %arg4[%c0_8, %c0_9] : memref<32x32xf32, #tpu.memory_space<vmem>>, vector<32x32xf32>
    %cst = arith.constant dense<0.000000e+00> : vector<8x32xf32>
    %7 = tpu.matmul %1, %6, %cst {dimension_numbers = #tpu.dot_dimension_numbers<[1], [0], [0], [1], [0, 0, 1, 1], [], []>} : vector<8x32xf32>, vector<32x32xf32>, vector<8x32xf32> -> vector<8x32xf32>
    %c0_10 = arith.constant 0 : index
    %c0_11 = arith.constant 0 : index
    %8 = vector.load %arg5[%c0_10, %c0_11] : memref<1x32xf32, #tpu.memory_space<vmem>>, vector<1x32xf32>
    %9 = vector.broadcast %8 : vector<1x32xf32> to vector<8x32xf32>
    %10 = arith.addf %7, %9 : vector<8x32xf32>
    %c0_12 = arith.constant 0 : index
    %c0_13 = arith.constant 0 : index
    %11 = vector.load %arg6[%c0_12, %c0_13] : memref<32x32xf32, #tpu.memory_space<vmem>>, vector<32x32xf32>
    %cst_14 = arith.constant dense<0.000000e+00> : vector<1x32xf32>
    %12 = tpu.matmul %3, %11, %cst_14 {dimension_numbers = #tpu.dot_dimension_numbers<[1], [0], [0], [1], [0, 0, 1, 1], [], []>} : vector<1x32xf32>, vector<32x32xf32>, vector<1x32xf32> -> vector<1x32xf32>
    %c0_15 = arith.constant 0 : index
    %c0_16 = arith.constant 0 : index
    %13 = vector.load %arg7[%c0_15, %c0_16] : memref<1x32xf32, #tpu.memory_space<vmem>>, vector<1x32xf32>
    %14 = arith.addf %12, %13 : vector<1x32xf32>
    %15 = vector.broadcast %14 : vector<1x32xf32> to vector<8x32xf32>
    %16 = arith.addf %10, %15 : vector<8x32xf32>
    %17 = math.tanh %16 : vector<8x32xf32>
    %c0_17 = arith.constant 0 : index
    %c0_18 = arith.constant 0 : index
    %18 = vector.load %arg8[%c0_17, %c0_18] : memref<1x32xf32, #tpu.memory_space<vmem>>, vector<1x32xf32>
    %cst_19 = arith.constant dense<0.000000e+00> : vector<1x8xf32>
    %19 = tpu.matmul %18, %17, %cst_19 {dimension_numbers = #tpu.dot_dimension_numbers<[1], [1], [0], [0], [0, 0, 1, 0], [], []>} : vector<1x32xf32>, vector<8x32xf32>, vector<1x8xf32> -> vector<1x8xf32>
    %c0_20 = arith.constant 0 : index
    %c0_21 = arith.constant 0 : index
    %20 = vector.load %arg9[%c0_20, %c0_21] : memref<1x1xf32, #tpu.memory_space<vmem>>, vector<1x1xf32>
    %21 = vector.broadcast %20 : vector<1x1xf32> to vector<1x8xf32>
    %22 = arith.addf %19, %21 : vector<1x8xf32>
    %cst_22 = arith.constant dense<0xFF800000> : vector<1xf32>
    %23 = vector.multi_reduction <maximumf>, %22, %cst_22 [1] : vector<1x8xf32> to vector<1xf32>
    %24 = vector.shape_cast %23 : vector<1xf32> to vector<1x1xf32>
    %25 = vector.broadcast %24 : vector<1x1xf32> to vector<1x8xf32>
    %26 = arith.subf %22, %25 : vector<1x8xf32>
    %27 = math.exp %26 : vector<1x8xf32>
    %cst_23 = arith.constant dense<0.000000e+00> : vector<1xf32>
    %28 = vector.multi_reduction <add>, %27, %cst_23 [1] : vector<1x8xf32> to vector<1xf32>
    %29 = vector.shape_cast %28 : vector<1xf32> to vector<1x1xf32>
    %30 = vector.broadcast %29 : vector<1x1xf32> to vector<1x8xf32>
    %31 = arith.divf %27, %30 : vector<1x8xf32>
    %cst_24 = arith.constant dense<0.000000e+00> : vector<1x32xf32>
    %32 = tpu.matmul %31, %1, %cst_24 {dimension_numbers = #tpu.dot_dimension_numbers<[1], [0], [0], [1], [0, 0, 1, 1], [], []>} : vector<1x8xf32>, vector<8x32xf32>, vector<1x32xf32> -> vector<1x32xf32>
    %c0_25 = arith.constant 0 : index
    %c0_26 = arith.constant 0 : index
    %33 = vector.load %arg10[%c0_25, %c0_26] : memref<32x32xf32, #tpu.memory_space<vmem>>, vector<32x32xf32>
    %cst_27 = arith.constant dense<0.000000e+00> : vector<1x32xf32>
    %34 = tpu.matmul %32, %33, %cst_27 {dimension_numbers = #tpu.dot_dimension_numbers<[1], [0], [0], [1], [0, 0, 1, 1], [], []>} : vector<1x32xf32>, vector<32x32xf32>, vector<1x32xf32> -> vector<1x32xf32>
    %c0_28 = arith.constant 0 : index
    %c0_29 = arith.constant 0 : index
    %35 = vector.load %arg11[%c0_28, %c0_29] : memref<32x32xf32, #tpu.memory_space<vmem>>, vector<32x32xf32>
    %cst_30 = arith.constant dense<0.000000e+00> : vector<1x32xf32>
    %36 = tpu.matmul %3, %35, %cst_30 {dimension_numbers = #tpu.dot_dimension_numbers<[1], [0], [0], [1], [0, 0, 1, 1], [], []>} : vector<1x32xf32>, vector<32x32xf32>, vector<1x32xf32> -> vector<1x32xf32>
    %37 = arith.addf %34, %36 : vector<1x32xf32>
    %c0_31 = arith.constant 0 : index
    %c0_32 = arith.constant 0 : index
    %38 = vector.load %arg12[%c0_31, %c0_32] : memref<16x32xf32, #tpu.memory_space<vmem>>, vector<16x32xf32>
    %cst_33 = arith.constant dense<0.000000e+00> : vector<1x32xf32>
    %39 = tpu.matmul %5, %38, %cst_33 {dimension_numbers = #tpu.dot_dimension_numbers<[1], [0], [0], [1], [0, 0, 1, 1], [], []>} : vector<1x16xf32>, vector<16x32xf32>, vector<1x32xf32> -> vector<1x32xf32>
    %40 = arith.addf %37, %39 : vector<1x32xf32>
    %c0_34 = arith.constant 0 : index
    %c0_35 = arith.constant 0 : index
    %41 = vector.load %arg13[%c0_34, %c0_35] : memref<1x32xf32, #tpu.memory_space<vmem>>, vector<1x32xf32>
    %42 = arith.addf %40, %41 : vector<1x32xf32>
    %c0_36 = arith.constant 0 : index
    %c0_37 = arith.constant 0 : index
    %43 = vector.load %arg14[%c0_36, %c0_37] : memref<32x32xf32, #tpu.memory_space<vmem>>, vector<32x32xf32>
    %cst_38 = arith.constant dense<0.000000e+00> : vector<1x32xf32>
    %44 = tpu.matmul %32, %43, %cst_38 {dimension_numbers = #tpu.dot_dimension_numbers<[1], [0], [0], [1], [0, 0, 1, 1], [], []>} : vector<1x32xf32>, vector<32x32xf32>, vector<1x32xf32> -> vector<1x32xf32>
    %c0_39 = arith.constant 0 : index
    %c0_40 = arith.constant 0 : index
    %45 = vector.load %arg15[%c0_39, %c0_40] : memref<32x32xf32, #tpu.memory_space<vmem>>, vector<32x32xf32>
    %cst_41 = arith.constant dense<0.000000e+00> : vector<1x32xf32>
    %46 = tpu.matmul %3, %45, %cst_41 {dimension_numbers = #tpu.dot_dimension_numbers<[1], [0], [0], [1], [0, 0, 1, 1], [], []>} : vector<1x32xf32>, vector<32x32xf32>, vector<1x32xf32> -> vector<1x32xf32>
    %47 = arith.addf %44, %46 : vector<1x32xf32>
    %c0_42 = arith.constant 0 : index
    %c0_43 = arith.constant 0 : index
    %48 = vector.load %arg16[%c0_42, %c0_43] : memref<16x32xf32, #tpu.memory_space<vmem>>, vector<16x32xf32>
    %cst_44 = arith.constant dense<0.000000e+00> : vector<1x32xf32>
    %49 = tpu.matmul %5, %48, %cst_44 {dimension_numbers = #tpu.dot_dimension_numbers<[1], [0], [0], [1], [0, 0, 1, 1], [], []>} : vector<1x16xf32>, vector<16x32xf32>, vector<1x32xf32> -> vector<1x32xf32>
    %50 = arith.addf %47, %49 : vector<1x32xf32>
    %c0_45 = arith.constant 0 : index
    %c0_46 = arith.constant 0 : index
    %51 = vector.load %arg17[%c0_45, %c0_46] : memref<1x32xf32, #tpu.memory_space<vmem>>, vector<1x32xf32>
    %52 = arith.addf %50, %51 : vector<1x32xf32>
    %53 = arith.maximumf %42, %52 : vector<1x32xf32>
    %c0_47 = arith.constant 0 : index
    %c0_48 = arith.constant 0 : index
    %c0_49 = arith.constant 0 : index
    %54 = vector.load %arg18[%c0_47, %c0_48, %c0_49] : memref<1x1x32xf32, #tpu.memory_space<vmem>>, vector<1x1x32xf32>
    %55 = vector.shape_cast %54 : vector<1x1x32xf32> to vector<1x32xf32>
    %56 = vector.shape_cast %53 : vector<1x32xf32> to vector<1x1x32xf32>
    tpu.vector_store %arg18[%c0_47, %c0_48, %c0_49], %56 {strides = array<i32>} : memref<1x1x32xf32, #tpu.memory_space<vmem>>, vector<1x1x32xf32>,
    %c0_50 = arith.constant 0 : index
    %c0_51 = arith.constant 0 : index
    %c0_52 = arith.constant 0 : index
    %57 = vector.load %arg19[%c0_50, %c0_51, %c0_52] : memref<1x1x8xf32, #tpu.memory_space<vmem>>, vector<1x1x8xf32>
    %58 = vector.shape_cast %57 : vector<1x1x8xf32> to vector<1x8xf32>
    %59 = vector.shape_cast %31 : vector<1x8xf32> to vector<1x1x8xf32>
    tpu.vector_store %arg19[%c0_50, %c0_51, %c0_52], %59 {strides = array<i32>} : memref<1x1x8xf32, #tpu.memory_space<vmem>>, vector<1x1x8xf32>,
    return
  }
  func.func @transform_0(%arg0: i32) -> (i32, i32, i32) {
    %c0_i32 = arith.constant 0 : i32
    %c0_i32_0 = arith.constant 0 : i32
    %c0_i32_1 = arith.constant 0 : i32
    return %arg0, %c0_i32, %c0_i32_0 : i32, i32, i32
  }
  func.func @transform_1(%arg0: i32) -> (i32, i32, i32) {
    %c0_i32 = arith.constant 0 : i32
    %c0_i32_0 = arith.constant 0 : i32
    %c0_i32_1 = arith.constant 0 : i32
    return %arg0, %c0_i32, %c0_i32_0 : i32, i32, i32
  }
  func.func @transform_2(%arg0: i32) -> (i32, i32, i32) {
    %c0_i32 = arith.constant 0 : i32
    %c0_i32_0 = arith.constant 0 : i32
    %c0_i32_1 = arith.constant 0 : i32
    return %arg0, %c0_i32, %c0_i32_0 : i32, i32, i32
  }
  func.func @transform_3(%arg0: i32) -> (i32, i32) {
    %c0_i32 = arith.constant 0 : i32
    %c0_i32_0 = arith.constant 0 : i32
    %c0_i32_1 = arith.constant 0 : i32
    return %c0_i32, %c0_i32_0 : i32, i32
  }
  func.func @transform_4(%arg0: i32) -> (i32, i32) {
    %c0_i32 = arith.constant 0 : i32
    %c0_i32_0 = arith.constant 0 : i32
    %c0_i32_1 = arith.constant 0 : i32
    return %c0_i32, %c0_i32_0 : i32, i32
  }
  func.func @transform_5(%arg0: i32) -> (i32, i32) {
    %c0_i32 = arith.constant 0 : i32
    %c0_i32_0 = arith.constant 0 : i32
    %c0_i32_1 = arith.constant 0 : i32
    return %c0_i32, %c0_i32_0 : i32, i32
  }
  func.func @transform_6(%arg0: i32) -> (i32, i32) {
    %c0_i32 = arith.constant 0 : i32
    %c0_i32_0 = arith.constant 0 : i32
    %c0_i32_1 = arith.constant 0 : i32
    return %c0_i32, %c0_i32_0 : i32, i32
  }
  func.func @transform_7(%arg0: i32) -> (i32, i32) {
    %c0_i32 = arith.constant 0 : i32
    %c0_i32_0 = arith.constant 0 : i32
    %c0_i32_1 = arith.constant 0 : i32
    return %c0_i32, %c0_i32_0 : i32, i32
  }
  func.func @transform_8(%arg0: i32) -> (i32, i32) {
    %c0_i32 = arith.constant 0 : i32
    %c0_i32_0 = arith.constant 0 : i32
    %c0_i32_1 = arith.constant 0 : i32
    return %c0_i32, %c0_i32_0 : i32, i32
  }
  func.func @transform_9(%arg0: i32) -> (i32, i32) {
    %c0_i32 = arith.constant 0 : i32
    %c0_i32_0 = arith.constant 0 : i32
    %c0_i32_1 = arith.constant 0 : i32
    return %c0_i32, %c0_i32_0 : i32, i32
  }
  func.func @transform_10(%arg0: i32) -> (i32, i32) {
    %c0_i32 = arith.constant 0 : i32
    %c0_i32_0 = arith.constant 0 : i32
    %c0_i32_1 = arith.constant 0 : i32
    return %c0_i32, %c0_i32_0 : i32, i32
  }
  func.func @transform_11(%arg0: i32) -> (i32, i32) {
    %c0_i32 = arith.constant 0 : i32
    %c0_i32_0 = arith.constant 0 : i32
    %c0_i32_1 = arith.constant 0 : i32
    return %c0_i32, %c0_i32_0 : i32, i32
  }
  func.func @transform_12(%arg0: i32) -> (i32, i32) {
    %c0_i32 = arith.constant 0 : i32
    %c0_i32_0 = arith.constant 0 : i32
    %c0_i32_1 = arith.constant 0 : i32
    return %c0_i32, %c0_i32_0 : i32, i32
  }
  func.func @transform_13(%arg0: i32) -> (i32, i32) {
    %c0_i32 = arith.constant 0 : i32
    %c0_i32_0 = arith.constant 0 : i32
    %c0_i32_1 = arith.constant 0 : i32
    return %c0_i32, %c0_i32_0 : i32, i32
  }
  func.func @transform_14(%arg0: i32) -> (i32, i32) {
    %c0_i32 = arith.constant 0 : i32
    %c0_i32_0 = arith.constant 0 : i32
    %c0_i32_1 = arith.constant 0 : i32
    return %c0_i32, %c0_i32_0 : i32, i32
  }
  func.func @transform_15(%arg0: i32) -> (i32, i32) {
    %c0_i32 = arith.constant 0 : i32
    %c0_i32_0 = arith.constant 0 : i32
    %c0_i32_1 = arith.constant 0 : i32
    return %c0_i32, %c0_i32_0 : i32, i32
  }
  func.func @transform_16(%arg0: i32) -> (i32, i32) {
    %c0_i32 = arith.constant 0 : i32
    %c0_i32_0 = arith.constant 0 : i32
    %c0_i32_1 = arith.constant 0 : i32
    return %c0_i32, %c0_i32_0 : i32, i32
  }
  func.func @transform_17(%arg0: i32) -> (i32, i32, i32) {
    %c0_i32 = arith.constant 0 : i32
    %c0_i32_0 = arith.constant 0 : i32
    %c0_i32_1 = arith.constant 0 : i32
    return %arg0, %c0_i32, %c0_i32_0 : i32, i32, i32
  }
  func.func @transform_18(%arg0: i32) -> (i32, i32, i32) {
    %c0_i32 = arith.constant 0 : i32
    %c0_i32_0 = arith.constant 0 : i32
    %c0_i32_1 = arith.constant 0 : i32
    return %arg0, %c0_i32, %c0_i32_0 : i32, i32, i32
  }
}

</mosaic_0001>

<bundles_post_ra>
// kernel: tpu_custom_call.1
= control target key start
LH: loop header
LB: loop body
LE: loop exit
PB: predicated region body
PF: predicated region fallthrough
CT: control target
= control target key end

     0   :  { %s3072_s0 = inlined_call_operand.hbm [shape: f32[2,8,32], index: 0, kind: input, shape index: {}]   ;;  %s3073_s1 = inlined_call_operand.vmem [shape: f32[2,1,32], index: 1, kind: input, shape index: {}]   ;;  %s3074_s2 = inlined_call_operand.vmem [shape: f32[2,1,16], index: 2, kind: input, shape index: {}]   ;;  %s3075_s3 = inlined_call_operand.hbm [shape: f32[32,32], index: 3, kind: input, shape index: {}]   ;;  %s3076_s4 = inlined_call_operand.hbm [shape: f32[1,32], index: 4, kind: input, shape index: {}]   ;;  %s3077_s5 = inlined_call_operand.hbm [shape: f32[32,32], index: 5, kind: input, shape index: {}]   ;;  %s3078_s6 = inlined_call_operand.hbm [shape: f32[1,32], index: 6, kind: input, shape index: {}]   ;;  %s3079_s7 = inlined_call_operand.hbm [shape: f32[1,32], index: 7, kind: input, shape index: {}]   ;;  %s3080_s8 = inlined_call_operand.<no memory space> [shape: f32[1,1], index: 8, kind: input, shape index: {}]   ;;  %s3081_s9 = inlined_call_operand.hbm [shape: f32[32,32], index: 9, kind: input, shape index: {}]   ;;  %s3082_s10 = inlined_call_operand.hbm [shape: f32[32,32], index: 10, kind: input, shape index: {}]   ;;  %s3083_s11 = inlined_call_operand.vmem [shape: f32[16,32], index: 11, kind: input, shape index: {}]   ;;  %s3084_s12 = inlined_call_operand.vmem [shape: f32[1,32], index: 12, kind: input, shape index: {}]   ;;  %s3085_s13 = inlined_call_operand.hbm [shape: f32[32,32], index: 13, kind: input, shape index: {}]   ;;  %s3086_s14 = inlined_call_operand.hbm [shape: f32[32,32], index: 14, kind: input, shape index: {}]   ;;  %s3087_s15 = inlined_call_operand.hbm [shape: f32[16,32], index: 15, kind: input, shape index: {}]   ;;  %s3088_s16 = inlined_call_operand.vmem [shape: f32[1,32], index: 16, kind: input, shape index: {}]   ;;  %s3089_s17 = inlined_call_operand.hbm [shape: f32[2,1,32], index: 17, kind: output, shape index: {0}]   ;;  %s3090_s18 = inlined_call_operand.hbm [shape: f32[2,1,8], index: 18, kind: output, shape index: {1}]  }
   0x1   :  { %3101 = sst [smem:[#allocation32_spill]] %s3072_s0  ;;  %v24_v0 = vstv %s3080_s8 }
   0x2   :  { %3102 = sst [smem:[#allocation33_spill]] %s3073_s1  ;;  %25 = vst [vmem:[#allocation2] sm:$0x1] %v24_v0 }
   0x3   :  { %3103 = sst [smem:[#allocation34_spill]] %s3074_s2 }
   0x4   :  { %3104 = sst [smem:[#allocation35_spill]] %s3075_s3 }
   0x5   :  { %3105 = sst [smem:[#allocation36_spill]] %s3076_s4 }
   0x6   :  { %3106 = sst [smem:[#allocation37_spill]] %s3077_s5 }
   0x7   :  { %3107 = sst [smem:[#allocation38_spill]] %s3078_s6 }
   0x8   :  { %3108 = sst [smem:[#allocation39_spill]] %s3079_s7 }
   0x9   :  { %3109 = sst [smem:[#allocation40_spill]] %s3081_s9 }
   0xa   :  { %3110 = sst [smem:[#allocation41_spill]] %s3082_s10 }
   0xb   :  { %3111 = sst [smem:[#allocation42_spill]] %s3085_s13 }
   0xc   :  { %3112 = sst [smem:[#allocation43_spill]] %s3086_s14 }
   0xd   :  { %3113 = sst [smem:[#allocation44_spill]] %s3089_s17 }
   0xe   :  { %26 = vsyncpa [#allocation4], 0 }
   0xf   :  { %28 = vsyncpa [#allocation4 + $0x1], 0 }
  0x10   :  { %29 = vsyncpa [#allocation7], 0 }
  0x11   :  { %30 = vsyncpa [#allocation10], 0 }
  0x12   :  { %31 = vsyncpa [#allocation13], 0 }
  0x13   :  { %32 = vsyncpa [#allocation16], 0 }
  0x14   :  { %33 = vsyncpa [#allocation19], 0 }
  0x15   :  { %34 = vsyncpa [#allocation5], 0 }
  0x16   :  { %36 = vsyncpa [#allocation5 + $0x1], 0 }
  0x17   :  { %37 = vsyncpa [#allocation23], 0 }
  0x18   :  { %39 = vsyncpa [#allocation23 + $0x1], 0  ;;  %s2665_s29 = smov 0   ;;  %s2667_s30 = smov 0  }
  0x19   :  { %s2669_s0 = smov 0   ;;  %s2671_s19 = smov 0  }
  0x1a LB: > { %s2549_s8 = smov [#allocation6]   ;;  %s2686_s20 = sadd.s32 4294967295, %s2547_s19   ;;  %s2547_s19 = sphi %s2671_s19, %s3156_s19   ;;  %s2543_s0 = sphi %s2669_s0, %s3155_s0   ;;  %s2539_s30 = sphi %s2667_s30, %s3154_s30   ;;  %s2535_s29 = sphi %s2665_s29, %s3153_s29  }
  0x1b   : > { %s486_s1 = sshll.u32 %s2549_s8, 4  ;;  %p1809_p0 = scmp.ge.s32.totalorder %s2547_s19, 1  ;;  %s487_s1 = int_to_ptr.vmem [resolvable:$true] %s486_s1 }
  0x1c   : > { %p3097_p1 = scmp.eq.s32.totalorder %s2686_s20, 0  ;;  %p474_p2 = scmp.lt.s32.totalorder %s2547_s19, 3 }
  0x1d   : > { %s2550_s22 = smov [#allocation9]   ;;  %s2551_s24 = smov [#allocation12]  }
  0x1e   : > { %p2691_p3 = pnand %p1809_p0, %p474_p2  ;;  %s510_s2 = sshll.u32 %s2550_s22, 4  ;;  %s2704_s2 = int_to_ptr.vmem [resolvable:$true] %s510_s2 }
  0x1f   : > { %s535_s25 = sshll.u32 %s2551_s24, 4  ;;  %s2156_s27 = scalar_lea.vmem %s487_s1, 512  ;;  %s2706_s25 = int_to_ptr.vmem [resolvable:$true] %s535_s25 }
  0x20   : > { %s3114_s21 = scalar_select %p2691_p3, 1, 0 }
  0x21   : > { %p2027_p5 = pneg %p2691_p3  ;;  %p2157_p8 = scmp.ne.s32.totalorder %s487_s1, %s2156_s27 }
  0x22   : > { %p2164_p11 = scmp.lt.s32.totalorder %s487_s1, %s487_s1  ;;  %p2165_p12 = scmp.lt.s32.totalorder %s2156_s27, %s2156_s27 }
  0x23   : > { %p2700_p6 = pnand %p2027_p5, %p3097_p1 }
  0x24   : > { %p2166_p13 = por %p2165_p12, %p2164_p11 }
  0x25   : > { %p2710_p7 = pneg %p2700_p6 }
  0x27   : > { %p2159_p9 = pnand %p2157_p8, %p2710_p7 }
  0x29   : > { %p2160_p10 = pneg %p2159_p9 }
  0x2b   : > { %p2167_p0 = pnand %p2166_p13, %p2160_p10 }
  0x2d   : > { %2170 = shalt.err (!%p2167_p0)
}
  0x2e   : > { %s3093_s28 = smov 128   ;;  %s3095_s8 = smov 8  }
  0x2f   : > { %s3117_s3 = sld [smem:[#allocation35_spill]]  ;;  %s2182_s17 = scalar_lea.vmem %s2704_s2, 512 }
  0x30   : > { %p2183_p2 = scmp.ne.s32.totalorder %s2704_s2, %s2182_s17  ;;  %p2190_p9 = scmp.lt.s32.totalorder %s2704_s2, %s2704_s2 }
  0x31   : > { %p2191_p10 = scmp.lt.s32.totalorder %s2182_s17, %s2182_s17 }
  0x32   : > { %p2185_p5 = pnand %p2183_p2, %p2710_p7 }
  0x33   : > { %p2192_p11 = por %p2191_p10, %p2190_p9 }
  0x34   : > { %p2186_p8 = pneg %p2185_p5 }
  0x35   : > { %2030 = dma.hbm_to_vmem [thread:$0]  (!%p2700_p6), %s3117_s3, 512, %s487_s1, [#allocation7], %s3093_s28, %s3093_s28, %s3095_s8  }
  0x36   : > { %p2193_p12 = pnand %p2192_p11, %p2186_p8 }
  0x38   : > { %2196 = shalt.err (!%p2193_p12)
}
  0x39   : > { %s3118_s5 = sld [smem:[#allocation37_spill]]  ;;  %s2208_s1 = scalar_lea.vmem %s2706_s25, 16 }
  0x3a   : > { %p2209_p13 = scmp.ne.s32.totalorder %s2706_s25, %s2208_s1  ;;  %s2215_s17 = scalar_lea.vmem %s2706_s25, 32 }
  0x3b   : > { %p2216_p5 = scmp.lt.s32.totalorder %s2706_s25, %s2706_s25  ;;  %p2217_p8 = scmp.lt.s32.totalorder %s2215_s17, %s2208_s1 }
  0x3c   : > { %p2211_p0 = pnand %p2209_p13, %p2710_p7 }
  0x3d   : > { %p2218_p9 = por %p2217_p8, %p2216_p5 }
  0x3e   : > { %p2212_p2 = pneg %p2211_p0 }
  0x3f   : > { %2036 = dma.hbm_to_vmem [thread:$0]  (!%p2700_p6), %s3118_s5, 512, %s2704_s2, [#allocation10], %s3093_s28, %s3093_s28, %s3095_s8  }
  0x40   : > { %p2219_p10 = pnand %p2218_p9, %p2212_p2 }
  0x42   : > { %2222 = shalt.err (!%p2219_p10)
}
  0x43   : > { %s3119_s7 = sld [smem:[#allocation39_spill]]  ;;  %s2554_s2 = smov [#allocation15]  }
  0x44   : > { %s561_s22 = sshll.u32 %s2554_s2, 4  ;;  %s2555_s28 = smov [#allocation18]   ;;  %s562_s22 = int_to_ptr.vmem [resolvable:$true] %s561_s22 }
  0x45   : > { %s593_s8 = sshll.u32 %s2555_s28, 4  ;;  %s2234_s3 = scalar_lea.vmem %s562_s22, 512  ;;  %s594_s8 = int_to_ptr.vmem [resolvable:$true] %s593_s8 }
  0x46   : > { %p2235_p11 = scmp.ne.s32.totalorder %s562_s22, %s2234_s3  ;;  %p2242_p0 = scmp.lt.s32.totalorder %s562_s22, %s562_s22 }
  0x47   : > { %p2243_p2 = scmp.lt.s32.totalorder %s2234_s3, %s2234_s3 }
  0x48   : > { %p2237_p12 = pnand %p2235_p11, %p2710_p7 }
  0x49   : > { %2042 = dma.hbm_to_vmem [thread:$0]  (!%p2700_p6), %s3119_s7, 16, %s2706_s25, [#allocation13]  }
  0x4a   : > { %p2238_p13 = pneg %p2237_p12  ;;  %p2244_p5 = por %p2243_p2, %p2242_p0 }
  0x4c   : > { %p2245_p8 = pnand %p2244_p5, %p2238_p13 }
  0x4e   : > { %2248 = shalt.err (!%p2245_p8)
}
  0x4f   : > { %s3120_s1 = smov 8   ;;  %s3121_s17 = smov 128  }
  0x50   : > { %s3122_s10 = sld [smem:[#allocation41_spill]]  ;;  %s2260_s28 = scalar_lea.vmem %s594_s8, 512 }
  0x51   : > { %p2261_p9 = scmp.ne.s32.totalorder %s594_s8, %s2260_s28  ;;  %p2268_p12 = scmp.lt.s32.totalorder %s594_s8, %s594_s8 }
  0x52   : > { %p2269_p0 = scmp.lt.s32.totalorder %s2260_s28, %s2260_s28 }
  0x53   : > { %p2263_p10 = pnand %p2261_p9, %p2710_p7 }
  0x54   : > { %p2270_p13 = por %p2269_p0, %p2268_p12 }
  0x55   : > { %p2264_p11 = pneg %p2263_p10 }
  0x56   : > { %2048 = dma.hbm_to_vmem [thread:$0]  (!%p2700_p6), %s3122_s10, 512, %s562_s22, [#allocation16], %s3121_s17, %s3121_s17, %s3120_s1  }
  0x57   : > { %p2271_p2 = pnand %p2270_p13, %p2264_p11 }
  0x59   : > { %2274 = shalt.err (!%p2271_p2)
}
  0x5a   : > { %s3123_s14 = sld [smem:[#allocation43_spill]]  ;;  %s2556_s2 = smov [#allocation8]  }
  0x5b   : > { %s500_s22 = sshll.u32 %s2556_s2, 4  ;;  %s2557_s25 = smov [#allocation11]   ;;  %s501_s22 = int_to_ptr.vmem [resolvable:$true] %s500_s22 }
  0x5c   : > { %s524_s24 = sshll.u32 %s2557_s25, 4  ;;  %s2286_s5 = scalar_lea.vmem %s501_s22, 16  ;;  %s525_s24 = int_to_ptr.vmem [resolvable:$true] %s524_s24 }
  0x5d   : > { %p2287_p5 = scmp.ne.s32.totalorder %s501_s22, %s2286_s5  ;;  %s2293_s28 = scalar_lea.vmem %s501_s22, 32 }
  0x5e   : > { %p2294_p10 = scmp.lt.s32.totalorder %s501_s22, %s501_s22  ;;  %p2295_p11 = scmp.lt.s32.totalorder %s2293_s28, %s2286_s5 }
  0x5f   : > { %p2289_p8 = pnand %p2287_p5, %p2710_p7 }
  0x60   : > { %2054 = dma.hbm_to_vmem [thread:$0]  (!%p2700_p6), %s3123_s14, 512, %s594_s8, [#allocation19], %s3121_s17, %s3121_s17, %s3120_s1  }
  0x61   : > { %p2290_p9 = pneg %p2289_p8  ;;  %p2296_p12 = por %p2295_p11, %p2294_p10 }
  0x63   : > { %p2297_p0 = pnand %p2296_p12, %p2290_p9 }
  0x65   : > { %2300 = shalt.err (!%p2297_p0)
}
  0x66   : > { %s3124_s4 = sld [smem:[#allocation36_spill]]  ;;  %s2312_s27 = scalar_lea.vmem %s525_s24, 16 }
  0x67   : > { %p2313_p13 = scmp.ne.s32.totalorder %s525_s24, %s2312_s27  ;;  %s2319_s2 = scalar_lea.vmem %s525_s24, 32 }
  0x68   : > { %p2320_p8 = scmp.lt.s32.totalorder %s525_s24, %s525_s24  ;;  %p2321_p4 = scmp.lt.s32.totalorder %s2319_s2, %s2312_s27 }
  0x69   : > { %p2315_p2 = pnand %p2313_p13, %p2710_p7 }
  0x6a   : > { %p2322_p1 = por %p2321_p4, %p2320_p8 }
  0x6b   : > { %p2316_p5 = pneg %p2315_p2 }
  0x6c   : > { %2033 = dma.hbm_to_vmem [thread:$0]  (!%p2700_p6), %s3124_s4, 16, %s501_s22, [#allocation7]  }
  0x6d   : > { %p2323_p10 = pnand %p2322_p1, %p2316_p5 }
  0x6f   : > { %2326 = shalt.err (!%p2323_p10)
}
  0x70   : > { %s3125_s6 = sld [smem:[#allocation38_spill]]  ;;  %s2558_s22 = smov [#allocation14]  }
  0x71   : > { %s548_s28 = sshll.u32 %s2558_s22, 4  ;;  %s2559_s3 = smov [#allocation17]   ;;  %s549_s28 = int_to_ptr.vmem [resolvable:$true] %s548_s28 }
  0x72   : > { %s580_s8 = sshll.u32 %s2559_s3, 4  ;;  %s2338_s4 = scalar_lea.vmem %s549_s28, 512  ;;  %s581_s8 = int_to_ptr.vmem [resolvable:$true] %s580_s8 }
  0x73   : > { %p2339_p9 = scmp.ne.s32.totalorder %s549_s28, %s2338_s4  ;;  %p2346_p4 = scmp.lt.s32.totalorder %s549_s28, %s549_s28 }
  0x74   : > { %p2347_p1 = scmp.lt.s32.totalorder %s2338_s4, %s2338_s4 }
  0x75   : > { %p2341_p11 = pnand %p2339_p9, %p2710_p7 }
  0x76   : > { %2039 = dma.hbm_to_vmem [thread:$0]  (!%p2700_p6), %s3125_s6, 16, %s525_s24, [#allocation10]  }
  0x77   : > { %p2342_p12 = pneg %p2341_p11  ;;  %p2348_p0 = por %p2347_p1, %p2346_p4 }
  0x79   : > { %p2349_p13 = pnand %p2348_p0, %p2342_p12 }
  0x7b   : > { %2352 = shalt.err (!%p2349_p13)
}
  0x7c   : > { %s3126_s9 = sld [smem:[#allocation40_spill]]  ;;  %s2364_s2 = scalar_lea.vmem %s581_s8, 512 }
  0x7d   : > { %p2365_p2 = scmp.ne.s32.totalorder %s581_s8, %s2364_s2  ;;  %p2372_p10 = scmp.lt.s32.totalorder %s581_s8, %s581_s8 }
  0x7e   : > { %p2373_p9 = scmp.lt.s32.totalorder %s2364_s2, %s2364_s2 }
  0x7f   : > { %p2367_p5 = pnand %p2365_p2, %p2710_p7 }
  0x80   : > { %p2374_p11 = por %p2373_p9, %p2372_p10 }
  0x81   : > { %p2368_p8 = pneg %p2367_p5 }
  0x82   : > { %2045 = dma.hbm_to_vmem [thread:$0]  (!%p2700_p6), %s3126_s9, 512, %s549_s28, [#allocation13], %s3121_s17, %s3121_s17, %s3120_s1  }
  0x83   : > { %p2375_p12 = pnand %p2374_p11, %p2368_p8 }
  0x85   : > { %2378 = shalt.err (!%p2375_p12)
}
  0x86   : > { %s3127_s13 = sld [smem:[#allocation42_spill]]  ;;  %s2560_s25 = smov [#allocation20]  }
  0x87   : > { %s606_s22 = sshll.u32 %s2560_s25, 4  ;;  %s607_s22 = int_to_ptr.vmem [resolvable:$true] %s606_s22 }
  0x88   : > { %s2390_s28 = scalar_lea.vmem %s607_s22, 256  ;;  %p2398_p13 = scmp.lt.s32.totalorder %s607_s22, %s607_s22 }
  0x89   : > { %p2391_p4 = scmp.ne.s32.totalorder %s607_s22, %s2390_s28  ;;  %p2399_p2 = scmp.lt.s32.totalorder %s2390_s28, %s2390_s28 }
  0x8b   : > { %p2393_p1 = pnand %p2391_p4, %p2710_p7  ;;  %p2400_p5 = por %p2399_p2, %p2398_p13 }
  0x8c   : > { %2051 = dma.hbm_to_vmem [thread:$0]  (!%p2700_p6), %s3127_s13, 512, %s581_s8, [#allocation16], %s3121_s17, %s3121_s17, %s3120_s1  }
  0x8d   : > { %p2394_p0 = pneg %p2393_p1 }
  0x8f   : > { %p2401_p8 = pnand %p2400_p5, %p2394_p0 }
  0x91   : > { %2404 = shalt.err (!%p2401_p8)
}
  0x92   : > { %2057 = dma.hbm_to_vmem [thread:$0]  (!%p2700_p6), %s3087_s15, 256, %s607_s22, [#allocation19], %s3121_s17, %s3121_s17, %s3120_s1  }
  0x93   : > { %s1808_s23 = sadd.s32 4294967294, %s2547_s19   ;;  %s2818_s26 = sadd.s32 1, %s2547_s19  }
  0x94   : > { %s49_s24 = ssub.s32 %s2547_s19, %s2818_s26  ;;  %s52_s27 = sadd.s32 1, %s2543_s0 }
  0x95   : > { %p50_p7 = scmp.eq.s32.totalorder %s49_s24, 0  ;;  %p59_p10 = scmp.ne.s32.totalorder %s2543_s0, %s2539_s30 }
  0x96   : > { %p60_p9 = scmp.eq.s32.totalorder %s2547_s19, 0  ;;  %p65_p11 = scmp.ne.s32.totalorder %s2539_s30, %s2535_s29 }
  0x97   : > { %s2829_s2 = scalar_select %p50_p7, %s2543_s0, %s52_s27  }
  0x98   : > { %p2831_p12 = por %p60_p9, %p59_p10  ;;  %p3129_p4 = scmp.eq.s32.totalorder %s2686_s20, 0 }
  0x99   : > { %p435_p1 = scmp.eq.s32.totalorder %s2686_s20, 1  ;;  %p441_p0 = scmp.eq.s32.totalorder %s1808_s23, 1 }
  0x9a   : > { %p2837_p6 = por %p3129_p4, %p65_p11  ;;  %p2079_p13 = scmp.lt.s32.totalorder %s2547_s19, 2 }
  0x9b   : > { %s623_s17 = sand.u32 1, %s2543_s0   ;;  %p2844_p2 = por %p435_p1, %p59_p10 }
  0x9c   : > { %s3130_s1 = scalar_select %p2837_p6, 1, 0 }
  0x9d   : > { %s3131_s5 = scalar_select %p2844_p2, 1, 0 }
  0x9e   : > { %p2848_p5 = por %p441_p0, %p65_p11  ;;  %s1821_s22 = sshll.u32 %s623_s17, 3 }
  0x9f   : > { %s1822_s28 = sshll.u32 %s2547_s19, 7  ;;  %s3133_s24 = sld [smem:[#allocation32_spill]] }
  0xa0   : > { %s3132_s25 = scalar_select %p2848_p5, 1, 0 }
  0xa1   : > { %s627_s23 = scalar_lea.vmem [#allocation3], %s1821_s22  ;;  %p2860_p8 = pnand %p2079_p13, %p2831_p12 }
  0xa2   : > { %s634_s6 = sshll.u32 %s627_s23, 4  ;;  %s624_s9 = scalar_lea.sflag [#allocation4], %s623_s17  ;;  %s635_s6 = int_to_ptr.vmem [resolvable:$true] %s634_s6 }
  0xa3   : > { %p2407_p10 = pneg %p2860_p8 }
  0xa5   : > { %s2856_s27 = scalar_lea.hbm %s3133_s24, %s1822_s28  ;;  %s2410_s8 = scalar_lea.hbm %s3133_s24, 256 }
  0xa6   : > { %s2405_s10 = scalar_lea.hbm %s2856_s27, 128  ;;  %p2411_p4 = scmp.lt.s32.totalorder %s2856_s27, %s3133_s24 }
  0xa7   : > { %p2406_p7 = scmp.ne.s32.totalorder %s2856_s27, %s2405_s10  ;;  %p2412_p12 = scmp.lt.s32.totalorder %s2410_s8, %s2405_s10 }
  0xa9   : > { %p2408_p9 = pnand %p2407_p10, %p2406_p7  ;;  %p2413_p1 = por %p2412_p12, %p2411_p4 }
  0xab   : > { %p2409_p11 = pneg %p2408_p9 }
  0xad   : > { %p2414_p0 = pnand %p2413_p1, %p2409_p11 }
  0xaf   : > { %2417 = shalt.err (!%p2414_p0)
}
  0xb0   : > { %s2418_s4 = scalar_lea.vmem %s635_s6, 128  ;;  %s2561_s17 = smov [#allocation3]  }
  0xb1   : > { %p2419_p13 = scmp.ne.s32.totalorder %s635_s6, %s2418_s4  ;;  %s2423_s13 = sshll.u32 %s2561_s17, 4  ;;  %s2424_s13 = int_to_ptr.vmem [resolvable:$false] %s2423_s13 }
  0xb2   : > { %s2425_s14 = scalar_lea.vmem %s2424_s13, 256  ;;  %p2426_p7 = scmp.lt.s32.totalorder %s635_s6, %s2424_s13 }
  0xb3   : > { %p2421_p5 = pnand %p2419_p13, %p2407_p10  ;;  %p2427_p9 = scmp.lt.s32.totalorder %s2425_s14, %s2418_s4 }
  0xb5   : > { %p2422_p2 = pneg %p2421_p5  ;;  %p2428_p6 = por %p2427_p9, %p2426_p7 }
  0xb7   : > { %p2429_p3 = pnand %p2428_p6, %p2422_p2 }
  0xb9   : > { %2432 = shalt.err (!%p2429_p3)
}
  0xba   : > { %2061 = dma.hbm_to_vmem [thread:$0]  (!%p2860_p8), %s2856_s27, 128, %s635_s6, %s624_s9  }
  0xbb   : > { %p3135_p11 = scmp.ne.s32.totalorder %s3114_s21, 0 }
  0xbc   : > { %s2881_s10 = sand.u32 (!%p3135_p11), 1, %s2539_s30   ;;  %p3136_p5 = scmp.ne.s32.totalorder (!%p3135_p11), %s3130_s1, 0 }
  0xbd   : > { %655 = sbr.rel (%p3135_p11) target bundleno = 1361 (0x551), region = 88  ;;  %s1824_s28 = sshll.u32 (!%p3135_p11), %s2881_s10, 3 }
  0xbe   : > { %s658_s3 = scalar_lea.sflag (!%p3135_p11), [#allocation4], %s2881_s10  ;;  %s2885_s13 = scalar_lea.vmem (!%p3135_p11), [#allocation3], %s1824_s28 }
  0xc2   : > { %2502 = dma.done.wait (%p3136_p5), %s658_s3, 128  }
  0xc3   : > { %2504 = vsyncadd (%p3136_p5), %s658_s3, 4294967168  ;;  %p3137_p3 = scmp.eq.s32.totalorder %s2686_s20, 0 }
  0xc5   : > { %2506 = dma.done.wait (%p3137_p3), [#allocation7], 528   ;;  %p3138_p6 = pmov %p3137_p3 }
  0xc6   : > { %p3139_p2 = pmov %p3137_p3 }
  0xc7   : > { %2508 = vsyncadd (%p3138_p6), [#allocation7], 4294966768 }
  0xc8   : > { %2510 = dma.done.wait (%p3139_p2), [#allocation10], 528   ;;  %p3140_p8 = pmov %p3139_p2 }
  0xc9   : > { %p3141_p10 = pmov %p3139_p2 }
  0xca   : > { %2512 = vsyncadd (%p3140_p8), [#allocation10], 4294966768 }
  0xcb   : > { %2514 = dma.done.wait (%p3141_p10), [#allocation13], 528   ;;  %p3142_p4 = pmov %p3139_p2 }
  0xcc   : > { %p3143_p12 = pmov %p3139_p2 }
  0xcd   : > { %2516 = vsyncadd (%p3142_p4), [#allocation13], 4294966768 }
  0xce   : > { %2518 = dma.done.wait (%p3143_p12), [#allocation16], 1024   ;;  %p3144_p1 = pmov %p3139_p2 }
  0xd0   : > { %2520 = vsyncadd (%p3144_p1), [#allocation16], 4294966272  ;;  %p3145_p0 = pmov %p3144_p1 }
  0xd2   : > { %2522 = dma.done.wait (%p3145_p0), [#allocation19], 768   ;;  %p3146_p13 = pmov %p3145_p0 }
  0xd3   : > { %v2562_v1 = vmov 0.0   ;;  %p763_p7 = scmp.lt.s32.totalorder %s2686_s20, 1  ;;  %vm2563_vm0 = vmmov 0   ;;  %v775_v2 = vld [vmem:[#allocation6 + $0x18] sm:$0xff]  ;;  %v774_v4 = vld [vmem:[#allocation6 + $0x10] sm:$0xff]  ;;  %v773_v6 = vld [vmem:[#allocation6 + $0x8] sm:$0xff]  ;;  %v935_v14 = vlaneseq }
  0xd4   : > { %2524 = vsyncadd (%p3146_p13), [#allocation19], 4294966528  ;;  %1891 = vmatprep.subr.mxu0 %v2562_v1  ;;  %1902 = vmatprep.subr.mxu1 %v2562_v1  ;;  %v860_v3 = vld [vmem:[#allocation9 + $0x18] sm:$0xff]  ;;  %v859_v5 = vld [vmem:[#allocation9 + $0x10] sm:$0xff]  ;;  %s3147_s14 = sld [smem:[#allocation33_spill]]  ;;  %vm783_vm1 = vcmask 261120  }
  0xd5   : > { %1899 = vmatprep.mubr.msk.f32.mxu0 %vm2563_vm0, %v2562_v1  ;;  %1910 = vmatprep.mubr.msk.f32.mxu1 %vm2563_vm0, %v2562_v1  ;;  %s2919_s6 = scalar_select %p763_p7, %s2686_s20, 1  ;;  %v858_v7 = vld [vmem:[#allocation9 + $0x8] sm:$0xff]  ;;  %v772_v8 = vld [vmem:[#allocation6] sm:$0xff]  ;;  %v2564_v13 = vmov 0   ;;  %v936_v15 = vshrl.u32 %v935_v14, 7  ;;  %vm1028_vm2 = vcmask 57344  }
  0xd6   : > { %1892 = vmatpush3.msra.mxu0 %v775_v2  ;;  %1903 = vmatpush3.msra.mxu1 %v860_v3  ;;  %v857_v9 = vld [vmem:[#allocation9] sm:$0xff]  ;;  %v769_v10 = vld [vmem:[%s2885_s13] sm:$0xff]  ;;  %v942_v12 = vld [vmem:[#allocation2] sm:$0x1]  ;;  %s3148_s23 = sld [smem:[#allocation34_spill]]  ;;  %vm1267_vm3 = vcmask 130048  }
  0xd7   : > { %1893 = vmatprep.subr.mxu0 %v2562_v1  ;;  %1904 = vmatprep.subr.mxu1 %v2562_v1  ;;  %v1835_v16 = vld [vmem:[#allocation8] ss:$0 sm:$0xff]  ;;  %v861_v17 = vld [vmem:[#allocation11] sm:$0x1]  ;;  %v937_v18 = vsub.s32 0, %v936_v15  ;;  %v1120_v41 = vld [vmem:[#allocation15 + $0x10] sm:$0xff] }
  0xd8   : > { %1894 = vmatpush3.msra.mxu0 %v774_v4  ;;  %1905 = vmatpush3.msra.mxu1 %v859_v5  ;;  %v941_v28 = vld [vmem:[#allocation12] sm:$0x1]  ;;  %v1119_v42 = vld [vmem:[#allocation15 + $0x8] sm:$0xff]  ;;  %v1118_v43 = vld [vmem:[#allocation15] sm:$0xff]  ;;  %vm1040_vm4 = vcmask 64512   ;;  %s762_s3 = scalar_lea.vmem [#allocation22], %s2881_s10 }
  0xd9   : > { %1895 = vmatprep.subr.mxu0 %v2562_v1  ;;  %1906 = vmatprep.subr.mxu1 %v2562_v1  ;;  %v1121_v40 = vld [vmem:[#allocation15 + $0x18] sm:$0xff]  ;;  %v1265_v45 = vld [vmem:[%s3083_s11] sm:$0xff]  ;;  %v1114_v56 = vld [vmem:[#allocation14] sm:$0xff]  ;;  %s1847_s13 = sshll.u32 %s2686_s20, 4  ;;  %p3149_p11 = scmp.ne.s32.totalorder %s3131_s5, 0 }
  0xda   : > { %s765_s21 = scalar_lea.vmem %s3147_s14, %s2919_s6  ;;  %1896 = vmatpush3.msra.mxu0 %v773_v6  ;;  %1907 = vmatpush3.msra.mxu1 %v858_v7  ;;  %v1266_v44 = vld [vmem:[%s3083_s11 + $0x8] sm:$0xff]  ;;  %v1345_v49 = vld [vmem:[#allocation17 + $0x8] sm:$0xff]  ;;  %v1344_v57 = vld [vmem:[#allocation17] sm:$0xff]  ;;  %s1599_s9 = scalar_lea.hbm %s3090_s18, %s1847_s13 }
  0xdb   : > { %v2930_v11 = vld [vmem:[%s765_s21] sm:$0x1]  ;;  %1897 = vmatprep.subr.mxu0 %v2562_v1  ;;  %1908 = vmatprep.subr.mxu1 %v2562_v1  ;;  %v1347_v47 = vld [vmem:[#allocation17 + $0x18] sm:$0xff]  ;;  %v1346_v48 = vld [vmem:[#allocation17 + $0x10] sm:$0xff]  ;;  %s1601_s14 = sshll.u32 %s762_s3, 4  ;;  %s1576_s21 = scalar_lea.sflag [#allocation23], %s2881_s10  ;;  %s1602_s14 = int_to_ptr.vmem [resolvable:$true] %s1601_s14 }
  0xdc   : > { %1898 = vmatpush3.msra.mxu0 %v772_v8  ;;  %1909 = vmatpush3.msra.mxu1 %v857_v9  ;;  %s768_s4 = scalar_lea.vmem %s3148_s23, %s2919_s6  ;;  %v1117_v53 = vld [vmem:[#allocation14 + $0x18] sm:$0xff]  ;;  %v1116_v54 = vld [vmem:[#allocation14 + $0x10] sm:$0xff]  ;;  %v1115_v55 = vld [vmem:[#allocation14 + $0x8] sm:$0xff]  ;;  %s2433_s1 = scalar_lea.vmem %s1602_s14, 16 }
  0xdd   : > { %1900 = vmatmul.mubr.msk.f32.vlgmr.msra.gmra.mxu0 %vm783_vm1, %v769_v10  ;;  %1911 = vmatmul.mubr.msk.f32.vlgmr.msra.gmra.mxu1 %vm783_vm1, %v2930_v11  ;;  %v2969_v46 = vld [vmem:[%s768_s4] sm:$0x1]  ;;  %v1351_v62 = vld [vmem:[#allocation18 + $0x18] sm:$0xff]  ;;  %v1350_v0 = vld [vmem:[#allocation18 + $0x10] sm:$0xff]  ;;  %p2434_p9 = scmp.ne.s32.totalorder %s1602_s14, %s2433_s1  ;;  %s2565_s27 = smov [#allocation22]  }
  0xde   : > { %1913 = vmatprep.subr.mxu0 %v2562_v1  ;;  %1915 = vmatprep.mubr.msk.f32.mxu0 %vm2563_vm0, %v2562_v1  ;;  %v1349_v3 = vld [vmem:[#allocation18 + $0x8] sm:$0xff]  ;;  %v1348_v4 = vld [vmem:[#allocation18] sm:$0xff]  ;;  %s2437_s8 = sshll.u32 %s2565_s27, 4  ;;  %s2438_s8 = int_to_ptr.vmem [resolvable:$false] %s2437_s8 }
  0xdf   : > { %1918 = vmatprep.subr.mxu1 %v2562_v1  ;;  %1920 = vmatprep.mubr.msk.f32.mxu1 %vm2563_vm0, %v2562_v1  ;;  %v1493_v5 = vld [vmem:[#allocation20 + $0x8] sm:$0xff]  ;;  %v1492_v6 = vld [vmem:[#allocation20] sm:$0xff]  ;;  %p2435_p5 = pnand %p2434_p9, %p3149_p11  ;;  %s2439_s22 = scalar_lea.vmem %s2438_s8, 32 }
  0xe0   : > { %1919 = vmatpush3.msra.mxu1 %v769_v10  ;;  %2138 = vset.pattern.permute.xlu0 %v2564_v13  ;;  %p2440_p6 = scmp.lt.s32.totalorder %s1602_s14, %s2438_s8  ;;  %p2441_p2 = scmp.lt.s32.totalorder %s2439_s22, %s2433_s1 }
  0xe1   : > { %1934 = vmatprep.subr.mxu1 %v2562_v1  ;;  %945 = vperm.xlu0 %2138, %v942_v12   ;;  %p2436_p3 = pneg %p2435_p5 }
  0xe2   : > { %p2442_p8 = por %p2441_p2, %p2440_p6 }
  0xe4   : > { %p2443_p10 = pnand %p2442_p8, %p2436_p3 }
 0x15c   : > { %v946_v29 = vpop.permute.xlu0 %945 }
 0x15d   : > { %v951_v30 = vrot.slane %v946_v29, %v937_v18 }
 0x19d   : > { %v853_v19 = vpop.f32.mrf.mxu0  ;;  %v931_v20 = vpop.f32.mrf.mxu1 }
 0x19e   : > { %v854_v21 = vadd.f32 %v1835_v16, %v853_v19  ;;  %v932_v22 = vadd.f32 %v931_v20, %v861_v17 }
 0x19f   : > { %v1901_v23 = vpop.f32.mrf.mxu0  ;;  %v1912_v24 = vpop.f32.mrf.mxu1 }
 0x1a0   : > { %v938_v25 = vrot.slane %v932_v22, %v937_v18 }
 0x1a2   : > { %v939_v26 = vadd.f32 %v938_v25, %v854_v21 }
 0x1a4   : > { %2139 = vtanh.f32 %v939_v26 }
 0x1b1   : > { %v2140_v27 = vpop.eup %2139 }
 0x1b2   : > { %1914 = vmatpush3.xpose.msk.msra.mxu0 %vm783_vm1, %v2140_v27 }
 0x1b3   : > { %1923 = vmatprep.subr.mxu0 %v2562_v1 }
 0x1b5   : > { %1916 = vmatmul.mubr.msk.f32.vlgmr.msra.gmra.mxu0 %vm783_vm1, %v941_v28 }
 0x1b6   : > { %1931 = vmatprep.mubr.msk.f32.mxu0 %vm2563_vm0, %v2562_v1  ;;  %1924 = vmatpush3.msra.mxu0 %v1121_v40 }
 0x1b7   : > { %1925 = vmatprep.subr.mxu0 %v2562_v1 }
 0x1b8   : > { %1926 = vmatpush3.msra.mxu0 %v1120_v41 }
 0x1b9   : > { %1927 = vmatprep.subr.mxu0 %v2562_v1 }
 0x1ba   : > { %1928 = vmatpush3.msra.mxu0 %v1119_v42 }
 0x1bb   : > { %1929 = vmatprep.subr.mxu0 %v2562_v1 }
 0x1bc   : > { %1930 = vmatpush3.msra.mxu0 %v1118_v43 }
 0x1bd   : > { %1945 = vmatprep.subr.mxu0 %v2562_v1  ;;  %1932 = vmatmul.mubr.msk.f32.vlgmr.msra.gmra.mxu0 %vm783_vm1, %v2930_v11 }
 0x1be   : > { %1946 = vmatpush3.msra.mxu0 %v1266_v44  ;;  %1949 = vmatprep.mubr.msk.f32.mxu0 %vm2563_vm0, %v2562_v1 }
 0x1bf   : > { %1947 = vmatprep.subr.mxu0 %v2562_v1 }
 0x1c0   : > { %1948 = vmatpush3.msra.mxu0 %v1265_v45 }
 0x1c1   : > { %1963 = vmatprep.subr.mxu0 %v2562_v1  ;;  %1950 = vmatmul.mubr.msk.f32.vlgmr.msra.gmra.mxu0 %vm1267_vm3, %v2969_v46 }
 0x1c2   : > { %1964 = vmatpush3.msra.mxu0 %v1347_v47  ;;  %1971 = vmatprep.mubr.msk.f32.mxu0 %vm2563_vm0, %v2562_v1 }
 0x1c3   : > { %1965 = vmatprep.subr.mxu0 %v2562_v1 }
 0x1c4   : > { %1966 = vmatpush3.msra.mxu0 %v1346_v48 }
 0x1c5   : > { %1967 = vmatprep.subr.mxu0 %v2562_v1 }
 0x1c6   : > { %1968 = vmatpush3.msra.mxu0 %v1345_v49 }
 0x1c7   : > { %1969 = vmatprep.subr.mxu0 %v2562_v1 }
 0x1c8   : > { %1970 = vmatpush3.msra.mxu0 %v1344_v57 }
 0x275   : > { %v1024_v31 = vpop.f32.mrf.mxu0 }
 0x276   : > { %v1025_v32 = vadd.f32 %v1024_v31, %v951_v30 }
 0x277   : > { %v1917_v33 = vpop.f32.mrf.mxu0 }
 0x278   : > { %v1029_v34 = vsel %vm1028_vm2, %v1025_v32, -inf }
 0x279   : > { %1030 = vmax.xlane.f32.xlu0 %v1029_v34 }
 0x27d   : > { %v1188_v58 = vpop.f32.mrf.mxu0 }
 0x27f   : > { %v1933_v59 = vpop.f32.mrf.mxu0 }
 0x281   : > { %v2990_v60 = vpop.f32.mrf.mxu0 }
 0x283   : > { %v1951_v61 = vpop.f32.mrf.mxu0 }
 0x302   : > { %v1031_v35 = vpop.xlane.xlu0 %1030 }
 0x303   : > { %v1032_v36 = vsub.f32 %v1025_v32, %v1031_v35 }
 0x305   : > { %v1033_v37 = vmul.f32 1.442695, %v1032_v36 }
 0x307   : > { %2141 = vpow2.f32 %v1033_v37 }
 0x314   : > { %v2142_v38 = vpop.eup %2141 }
 0x315   : > { %v1035_v39 = vsel %vm1028_vm2, %v2142_v38, 0.0 }
 0x316   : > { %1036 = vadd.xlane.f32.xlu1 %v1035_v39 }
 0x39f   : > { %v1037_v50 = vpop.xlane.xlu1 %1036 }
 0x3a0   : > { %2143 = vrcp.f32 %v1037_v50 }
 0x3ad   : > { %v2144_v51 = vpop.eup %2143 }
 0x3ae   : > { %v1039_v52 = vmul.f32 %v2144_v51, %v2142_v38 }
 0x3b0   : > { %1921 = vmatmul.mubr.msk.f32.vlgmr.msra.gmra.mxu1 %vm1040_vm4, %v1039_v52  ;;  %1570 = vst.msk [vmem:[%s762_s3] sm:$0x1] %vm1028_vm2, %v1039_v52 }
 0x3b1   : > { %1935 = vmatpush3.msra.mxu1 %v1117_v53  ;;  %1942 = vmatprep.mubr.msk.f32.mxu1 %vm2563_vm0, %v2562_v1 }
 0x3b2   : > { %1936 = vmatprep.subr.mxu1 %v2562_v1 }
 0x3b3   : > { %1937 = vmatpush3.msra.mxu1 %v1116_v54 }
 0x3b4   : > { %1938 = vmatprep.subr.mxu1 %v2562_v1 }
 0x3b5   : > { %1939 = vmatpush3.msra.mxu1 %v1115_v55 }
 0x3b6   : > { %1940 = vmatprep.subr.mxu1 %v2562_v1 }
 0x3b7   : > { %1941 = vmatpush3.msra.mxu1 %v1114_v56 }
 0x3b8   : > { %1952 = vmatprep.subr.mxu1 %v2562_v1 }
 0x470   : > { %v1110_v63 = vpop.f32.mrf.mxu1 }
 0x471   : > { %1943 = vmatmul.mubr.msk.f32.vlgmr.msra.gmra.mxu1 %vm783_vm1, %v1110_v63  ;;  %1972 = vmatmul.mubr.msk.f32.vlgmr.msra.gmra.mxu0 %vm783_vm1, %v1110_v63 }
 0x472   : > { %1953 = vmatpush3.msra.mxu1 %v1351_v62  ;;  %v1922_v2 = vpop.f32.mrf.mxu1  ;;  %1960 = vmatprep.mubr.msk.f32.mxu1 %vm2563_vm0, %v2562_v1 }
 0x473   : > { %1954 = vmatprep.subr.mxu1 %v2562_v1 }
 0x474   : > { %1955 = vmatpush3.msra.mxu1 %v1350_v0 }
 0x475   : > { %1956 = vmatprep.subr.mxu1 %v2562_v1 }
 0x476   : > { %1957 = vmatpush3.msra.mxu1 %v1349_v3 }
 0x477   : > { %1958 = vmatprep.subr.mxu1 %v2562_v1 }
 0x478   : > { %1959 = vmatpush3.msra.mxu1 %v1348_v4 }
 0x479   : > { %1961 = vmatmul.mubr.msk.f32.vlgmr.msra.gmra.mxu1 %vm783_vm1, %v2930_v11  ;;  %1974 = vmatprep.subr.mxu1 %v2562_v1 }
 0x47a   : > { %1975 = vmatpush3.msra.mxu1 %v1493_v5  ;;  %1978 = vmatprep.mubr.msk.f32.mxu1 %vm2563_vm0, %v2562_v1 }
 0x47b   : > { %1976 = vmatprep.subr.mxu1 %v2562_v1 }
 0x47c   : > { %1977 = vmatpush3.msra.mxu1 %v1492_v6 }
 0x47d   : > { %1979 = vmatmul.mubr.msk.f32.vlgmr.msra.gmra.mxu1 %vm1267_vm3, %v2969_v46 }
 0x47e   : > { %2446 = shalt.err (!%p2443_p10)
}
 0x47f   : > { %s2447_s23 = scalar_lea.hbm %s1599_s9, 16  ;;  %s2451_s28 = scalar_lea.hbm %s3090_s18, 32 }
 0x480   : > { %p2448_p4 = scmp.ne.s32.totalorder %s1599_s9, %s2447_s23  ;;  %p2452_p0 = scmp.lt.s32.totalorder %s1599_s9, %s3090_s18 }
 0x481   : > { %p2453_p13 = scmp.lt.s32.totalorder %s2451_s28, %s2447_s23 }
 0x482   : > { %p2449_p12 = pnand %p2448_p4, %p3149_p11 }
 0x483   : > { %p2454_p7 = por %p2453_p13, %p2452_p0 }
 0x484   : > { %p2450_p1 = pneg %p2449_p12 }
 0x486   : > { %p2455_p9 = pnand %p2454_p7, %p2450_p1 }
 0x488   : > { %2458 = shalt.err (!%p2455_p9)
}
 0x489   : > { %2024 = dma.vmem_to_hbm [thread:$0]  (%p3149_p11), %s1602_s14, 16, %s1599_s9, %s1576_s21   ;;  %v1342_v15 = vld [vmem:[%s3084_s12] sm:$0x1]  ;;  %vm1568_vm5 = vcmask 253952  }
 0x48a   : > { %v1565_v17 = vld [vmem:[%s3088_s16] sm:$0x1]  ;;  %s756_s9 = scalar_lea.vmem [#allocation21], %s2881_s10  ;;  %s3150_s23 = sld [smem:[#allocation44_spill]] }
 0x48b   : > { %s1588_s14 = sshll.u32 %s756_s9, 4  ;;  %s1572_s17 = scalar_lea.sflag [#allocation5], %s2881_s10  ;;  %s1589_s14 = int_to_ptr.vmem [resolvable:$true] %s1588_s14 }
 0x48c   : > { %s2459_s28 = scalar_lea.vmem %s1589_s14, 16  ;;  %s2566_s3 = smov [#allocation21]  }
 0x48d   : > { %p2460_p5 = scmp.ne.s32.totalorder %s1589_s14, %s2459_s28  ;;  %s2463_s6 = sshll.u32 %s2566_s3, 4  ;;  %s2464_s6 = int_to_ptr.vmem [resolvable:$false] %s2463_s6 }
 0x48e   : > { %s2465_s7 = scalar_lea.vmem %s2464_s6, 32  ;;  %p2466_p2 = scmp.lt.s32.totalorder %s1589_s14, %s2464_s6 }
 0x48f   : > { %p2461_p3 = pnand %p2460_p5, %p3149_p11  ;;  %p2467_p8 = scmp.lt.s32.totalorder %s2465_s7, %s2459_s28 }
 0x490   : > { %s1586_s4 = scalar_lea.hbm %s3150_s23, %s1847_s13 }
 0x491   : > { %p2462_p6 = pneg %p2461_p3  ;;  %p2468_p10 = por %p2467_p8, %p2466_p2 }
 0x493   : > { %p2469_p4 = pnand %p2468_p10, %p2462_p6 }
 0x531   : > { %v1261_v1 = vpop.f32.mrf.mxu1  ;;  %v1488_v7 = vpop.f32.mrf.mxu0 }
 0x532   : > { %v1262_v10 = vadd.f32 %v1261_v1, %v1188_v58 }
 0x533   : > { %v1944_v8 = vpop.f32.mrf.mxu1  ;;  %v1973_v9 = vpop.f32.mrf.mxu0 }
 0x534   : > { %v1341_v13 = vadd.f32 %v2990_v60, %v1262_v10 }
 0x536   : > { %v1343_v20 = vadd.f32 %v1342_v15, %v1341_v13 }
 0x539   : > { %v1418_v11 = vpop.f32.mrf.mxu1 }
 0x53a   : > { %v1489_v14 = vadd.f32 %v1488_v7, %v1418_v11 }
 0x53b   : > { %v1962_v12 = vpop.f32.mrf.mxu1 }
 0x53d   : > { %v1560_v16 = vpop.f32.mrf.mxu1 }
 0x53e   : > { %v1564_v18 = vadd.f32 %v1560_v16, %v1489_v14 }
 0x53f   : > { %v1980_v19 = vpop.f32.mrf.mxu1 }
 0x540   : > { %v1566_v21 = vadd.f32 %v1565_v17, %v1564_v18 }
 0x542   : > { %v1567_v22 = vmax.f32 %v1343_v20, %v1566_v21 }
 0x544   : > { %1569 = vst.msk [vmem:[%s756_s9] sm:$0x1] %vm1568_vm5, %v1567_v22 }
 0x545   : > { %2472 = shalt.err (!%p2469_p4)
}
 0x546   : > { %s2473_s20 = scalar_lea.hbm %s1586_s4, 16  ;;  %s2477_s1 = scalar_lea.hbm %s3150_s23, 32 }
 0x547   : > { %p2474_p12 = scmp.ne.s32.totalorder %s1586_s4, %s2473_s20  ;;  %p2478_p13 = scmp.lt.s32.totalorder %s1586_s4, %s3150_s23 }
 0x548   : > { %p2479_p7 = scmp.lt.s32.totalorder %s2477_s1, %s2473_s20 }
 0x549   : > { %p2475_p1 = pnand %p2474_p12, %p3149_p11 }
 0x54a   : > { %p2480_p9 = por %p2479_p7, %p2478_p13 }
 0x54b   : > { %p2476_p0 = pneg %p2475_p1 }
 0x54d   : > { %p2481_p5 = pnand %p2480_p9, %p2476_p0 }
 0x54f   : > { %2484 = shalt.err (!%p2481_p5)
}
 0x550   : > { %2023 = dma.vmem_to_hbm [thread:$0]  (%p3149_p11), %s1589_s14, 16, %s1586_s4, %s1572_s17  }
 0x551 PF: > { %s1613_s9 = sand.u32 1, %s2535_s29   ;;  %p3151_p3 = scmp.ne.s32.totalorder %s3132_s25, 0 }
 0x552   : > { %p3152_p6 = scmp.ge.s32.totalorder %s2547_s19, 2  ;;  %s1614_s21 = scalar_lea.sflag [#allocation5], %s1613_s9 }
 0x554   : > { %p2063_p2 = pnand %p3152_p6, %p3151_p3 }
 0x556   : > { %p2064_p8 = pneg %p2063_p2 }
 0x558   : > { %2526 = dma.done.wait (%p2064_p8), %s1614_s21, 16  }
 0x559   : > { %2528 = vsyncadd (%p2064_p8), %s1614_s21, 4294967280  ;;  %s1622_s22 = scalar_lea.sflag [#allocation23], %s1613_s9 }
 0x55a   : > { %2530 = dma.done.wait (%p2064_p8), %s1622_s22, 16  }
 0x55b   : > { %2532 = vsyncadd (%p2064_p8), %s1622_s22, 4294967280  ;;  %p42_p11 = scmp.ge.s32.totalorder %s2818_s26, 4   ;;  %s3153_s29 = smov %s2539_s30 }
 0x55c   : > { %s3154_s30 = smov %s2543_s0  ;;  %s3155_s0 = smov %s2829_s2 }
 0x55d   : > { %s3156_s19 = smov %s2818_s26  ;;  %44 = sbr.rel (!%p42_p11) target bundleno = 26 (0x1a), region = 196 }
 0x562   :  { %1626 = vsyncpa [#allocation4], 1 }
 0x563   :  { %1628 = vsyncpa [#allocation4 + $0x1], 1 }
 0x564   :  { %1629 = vsyncpa [#allocation7], 1 }
 0x565   :  { %1630 = vsyncpa [#allocation10], 1 }
 0x566   :  { %1631 = vsyncpa [#allocation13], 1 }
 0x567   :  { %1632 = vsyncpa [#allocation16], 1 }
 0x568   :  { %1633 = vsyncpa [#allocation19], 1 }
 0x569   :  { %1634 = vsyncpa [#allocation5], 1 }
 0x56a   :  { %1636 = vsyncpa [#allocation5 + $0x1], 1 }
 0x56b   :  { %1637 = vsyncpa [#allocation23], 1 }
 0x56c   :  { %1639 = vsyncpa [#allocation23 + $0x1], 1 }

</bundles_post_ra>
